<compile_context>
chip_gen: v7x
topology: tpu7x:2x2x1
jax: 0.10.0
libtpu: 0.0.40
codegen_flags: <defaults>
</compile_context>

<pallas_src>
import functools

import numpy as np
import jax
import jax.numpy as jnp
from jax.experimental import pallas as pl
from jax.experimental.pallas import tpu as pltpu


def _round_up(x, m):
    return ((x + m - 1) // m) * m


def _ctc_kernel(em_ref, halo_ref, out_ref, *, blank, num_labels, chunk_t):
    """One time-tile of the greedy CTC decode.

    em_ref:   (tile_t, L)  natural-layout emission block (time x labels).
    halo_ref: (8, L)       rows [i*tile_t-8, i*tile_t); the previous tile's
                           last timestep lives in row 7 (ignored when i == 0).
    out_ref:  (1, tile_t)  int32, lane-dense: kept label index per timestep,
                           else -1.
    """
    i = pl.program_id(0)
    tile_t, L = em_ref.shape
    is_float = jnp.issubdtype(em_ref.dtype, jnp.floating)
    num_chunks = tile_t // chunk_t

    def argmax_over_sublanes(x):
        # x: (L, n) with labels on the sublane axis -> (1, n) int32,
        # first-occurrence tie-break.  NaN treated as +inf (matches np/torch
        # argmax except when a true +inf precedes the first NaN).  Clamp so a
        # host label lookup can never go out of bounds.
        if is_float:
            x = jnp.where(x != x, jnp.inf, x)
        mx = jnp.max(x, axis=0, keepdims=True)
        lab = jax.lax.broadcasted_iota(jnp.int32, x.shape, 0)
        cand = jnp.where(x == mx, lab, jnp.int32(num_labels))
        return jnp.minimum(jnp.min(cand, axis=0, keepdims=True),
                           jnp.int32(num_labels - 1))

    def argmax_over_lanes(x):
        # x: (1, L) with labels on the lane axis -> (1, 1) int32.  Exact
        # compares only, so the halo recomputation agrees bit-for-bit with the
        # previous tile's own result for that timestep.
        if is_float:
            x = jnp.where(x != x, jnp.inf, x)
        mx = jnp.max(x, axis=1, keepdims=True)
        lab = jax.lax.broadcasted_iota(jnp.int32, x.shape, 1)
        cand = jnp.where(x == mx, lab, jnp.int32(num_labels))
        return jnp.minimum(jnp.min(cand, axis=1, keepdims=True),
                           jnp.int32(num_labels - 1))

    # Previous timestep's argmax for the first timestep of this tile: -1 for
    # the very first tile, otherwise recomputed from the halo.  No serial
    # carry -> the grid axis can be "parallel".
    prev_carry = jnp.where(i == 0, jnp.int32(-1),
                           argmax_over_lanes(halo_ref[7:8, :]))       # (1, 1)

    # Unrolled chunk loop: keeps per-chunk intermediates small while the outer
    # tile stays large enough to amortize per-grid-step overhead.
    for c in range(num_chunks):
        em_c = em_ref[pl.ds(c * chunk_t, chunk_t), :]                 # (chunk_t, L)
        em_lt = em_c.T               # on-chip relayout: time -> lanes (XLU)
        idx = argmax_over_sublanes(em_lt)                             # (1, chunk_t)

        # unique_consecutive + blank removal: compare with previous timestep.
        col = jax.lax.broadcasted_iota(jnp.int32, idx.shape, 1)
        prev = pltpu.roll(idx, shift=1, axis=1)                       # lane roll (XLU)
        prev = jnp.where(col == 0, prev_carry, prev)
        keep = jnp.logical_and(idx != prev, idx != jnp.int32(blank))

        out_ref[:, pl.ds(c * chunk_t, chunk_t)] = jnp.where(
            keep, idx, jnp.int32(-1))
        prev_carry = idx[:, chunk_t - 1:]     # last-lane slice, not a reduction


@functools.partial(jax.jit, static_argnames=("blank", "tile_t", "chunk_t"))
def _ctc_decode_device(emission, *, blank, tile_t, chunk_t):
    """emission: (T, L) logits.  Returns int32 (T,): label index if kept, else -1."""
    T, L = emission.shape
    num_tiles = pl.cdiv(T, tile_t)
    blocks_per_tile = tile_t // 8
    dsize = jnp.dtype(emission.dtype).itemsize

    # Right-sized VMEM budget: double-buffered *lane-padded* input block, tiny
    # halo, sublane-padded int32 output, plus headroom for chunk-sized
    # intermediates / compiler temporaries.  Stays well inside v7x's 64 MiB.
    lanes = max(128, _round_up(L, 128))
    vmem_limit = (2 * tile_t * lanes * dsize          # main input, x2 buffers
                  + 2 * 8 * lanes * dsize             # halo, x2 buffers
                  + 2 * 8 * tile_t * 4                # (1, tile_t) int32 output
                  + 8 * 1024 * 1024)                  # headroom
    vmem_limit = max(16 * 1024 * 1024, min(vmem_limit, 48 * 1024 * 1024))

    packed = pl.pallas_call(
        functools.partial(_ctc_kernel, blank=blank, num_labels=L,
                          chunk_t=chunk_t),
        grid_spec=pltpu.PrefetchScalarGridSpec(
            num_scalar_prefetch=0,
            grid=(num_tiles,),
            in_specs=[
                # Natural (T, L) layout read straight from HBM -- no wrapper
                # pad/transpose pre-pass.  The partial last block's OOB rows
                # are garbage, but they only feed timesteps >= T whose output
                # stores are dropped and which nothing ever looks back at.
                pl.BlockSpec((tile_t, L), lambda i: (i, 0)),
                # 8-row halo ending at the previous tile's last timestep
                # (clamped to block 0 for i == 0, where it is ignored).
                pl.BlockSpec(
                    (8, L),
                    lambda i: (jnp.maximum(i * blocks_per_tile - 1, 0), 0)),
            ],
            out_specs=pl.BlockSpec((1, tile_t), lambda i: (0, i)),
        ),
        out_shape=jax.ShapeDtypeStruct((1, T), jnp.int32),
        compiler_params=pltpu.CompilerParams(
            # Tiles are independent (halo instead of carry) -> lets v7x shard
            # the time axis across both TensorCores; neutral on v5e/v6e.
            dimension_semantics=("parallel",),
            vmem_limit_bytes=int(vmem_limit),
        ),
        cost_estimate=pl.CostEstimate(
            flops=4 * T * L,
            transcendentals=0,
            bytes_accessed=T * L * dsize + T * 4 + num_tiles * 8 * L * dsize,
        ),
    )(emission, emission)
    return packed[0]


def greedy_ctc_decode(emission, labels, blank=0, tile_t=None, chunk_t=1024):
    """Greedy CTC decode of emission [num_seq, num_label] -> (transcript, packed).

    Matches torch semantics: argmax over labels, unique_consecutive, drop the
    blank, join label strings.  Feed bf16 from the producer when possible --
    argmax only needs ordering and it halves the dominant HBM read.
    """
    T, L = emission.shape
    dsize = jnp.dtype(emission.dtype).itemsize
    lanes = max(128, _round_up(L, 128))

    if tile_t is None:
        # Few, fat tiles: keep the double-buffered lane-padded input footprint
        # <= ~16 MiB (safe on every generation, amortizes per-step overhead on
        # v7x's fast HBM); the inner chunk loop bounds the intermediates.
        budget = 16 * 1024 * 1024
        max_tile = max(chunk_t,
                       ((budget // (2 * lanes * dsize)) // chunk_t) * chunk_t)
        tile_t = min(max_tile, _round_up(T, 128))
    tile_t = int(tile_t)
    if tile_t % 128 != 0:
        raise ValueError("tile_t must be a multiple of 128")
    chunk_t = int(min(chunk_t, tile_t))
    if tile_t % chunk_t != 0:
        chunk_t = 128

    packed = _ctc_decode_device(emission, blank=int(blank), tile_t=tile_t,
                                chunk_t=chunk_t)
    packed = np.asarray(jax.block_until_ready(packed))

    # Host-side glue (no Pallas equivalent): vectorized label lookup + join.
    lab_arr = np.asarray(labels)
    kept = packed[packed >= 0]
    transcript = ''.join(lab_arr[kept].tolist()) if kept.size else ''
    return transcript, packed


def _reference_decode(emission_np, labels, blank=0):
    indices = np.argmax(emission_np, axis=-1)
    out, prev = [], None
    for i in indices:
        if (prev is None or i != prev) and i != blank:
            out.append(labels[int(i)])
        prev = i
    return ''.join(out)


if __name__ == "__main__":
    # 32 labels: index 0 is the blank token "-".
    labels = ["-"] + list("abcdefghijklmnopqrstuvwxyz") + list("01234")
    assert len(labels) == 32

    key = jax.random.PRNGKey(0)
    base = jax.random.normal(key, (100, 32), dtype=jnp.float32)
    # Repeat factor 3 -> runs of identical argmaxes (exercises
    # unique_consecutive), with runs crossing the 128/256-timestep tile
    # boundaries (exercises the halo-based cross-tile dedup).
    emission = jnp.repeat(base, 3, axis=0)                      # (300, 32)

    ref = _reference_decode(np.asarray(emission), labels, blank=0)

    # 3 tiles of 128 (partial last tile): exercises halo dedup across tiles.
    out_a, _ = greedy_ctc_decode(emission, labels, blank=0, tile_t=128)
    # 2 tiles of 256, 2 chunks of 128 each: intra-tile chunk carry + halo.
    out_b, _ = greedy_ctc_decode(emission, labels, blank=0, tile_t=256,
                                 chunk_t=128)
    # Adaptive tile: a single 384-wide tile covering all timesteps.
    out_c, _ = greedy_ctc_decode(emission, labels, blank=0)

    assert out_a == ref, (out_a, ref)
    assert out_b == ref, (out_b, ref)
    assert out_c == ref, (out_c, ref)
    print("KERNEL_OK")
</pallas_src>

<mosaic_0001>
module attributes {stable_mosaic.version = 11 : i64} {
  func.func @_ctc_kernel(%arg0: i32, %arg1: memref<128x32xf32, #tpu.memory_space<vmem>>, %arg2: memref<8x32xf32, #tpu.memory_space<vmem>>, %arg3: memref<1x128xi32, #tpu.memory_space<vmem>>) attributes {dimension_semantics = [#tpu.dimension_semantics<parallel>], iteration_bounds = array<i64: 3>, scalar_prefetch = 0 : i64, scratch_operands = 0 : i64, tpu.core_type = #tpu.core_type<tc>, window_params = [{transform_indices = @transform_0, window_bounds = array<i64: 128, 32>}, {transform_indices = @transform_1, window_bounds = array<i64: 8, 32>}, {transform_indices = @transform_2, window_bounds = array<i64: 1, 128>}]} {
    %c0_i32 = arith.constant 0 : i32
    %0 = arith.cmpi eq, %arg0, %c0_i32 : i32
    %c7 = arith.constant 7 : index
    %c0 = arith.constant 0 : index
    %1 = vector.load %arg2[%c7, %c0] : memref<8x32xf32, #tpu.memory_space<vmem>>, vector<1x32xf32>
    %2 = arith.cmpf one, %1, %1 : vector<1x32xf32>
    %cst = arith.constant 0x7F800000 : f32
    %3 = vector.broadcast %cst : f32 to vector<1x32xf32>
    %4 = arith.select %2, %3, %1 : vector<1x32xi1>, vector<1x32xf32>
    %cst_0 = arith.constant dense<0xFF800000> : vector<1xf32>
    %5 = vector.multi_reduction <maximumf>, %4, %cst_0 [1] : vector<1x32xf32> to vector<1xf32>
    %6 = vector.shape_cast %5 : vector<1xf32> to vector<1x1xf32>
    %7 = tpu.iota {dimensions = array<i32: 1>} : vector<1x32xi32>
    %8 = vector.broadcast %6 : vector<1x1xf32> to vector<1x32xf32>
    %9 = arith.cmpf oeq, %4, %8 : vector<1x32xf32>
    %c32_i32 = arith.constant 32 : i32
    %10 = vector.broadcast %c32_i32 : i32 to vector<1x32xi32>
    %11 = arith.select %9, %7, %10 : vector<1x32xi1>, vector<1x32xi32>
    %cst_1 = arith.constant dense<2147483647> : vector<1xi32>
    %12 = vector.multi_reduction <minsi>, %11, %cst_1 [1] : vector<1x32xi32> to vector<1xi32>
    %13 = vector.shape_cast %12 : vector<1xi32> to vector<1x1xi32>
    %c31_i32 = arith.constant 31 : i32
    %14 = vector.broadcast %c31_i32 : i32 to vector<1x1xi32>
    %15 = arith.minsi %13, %14 : vector<1x1xi32>
    %c-1_i32 = arith.constant -1 : i32
    %16 = vector.broadcast %c-1_i32 : i32 to vector<1x1xi32>
    %17 = arith.select %0, %16, %15 : vector<1x1xi32>
    %c0_2 = arith.constant 0 : index
    %c0_3 = arith.constant 0 : index
    %18 = vector.load %arg1[%c0_2, %c0_3] : memref<128x32xf32, #tpu.memory_space<vmem>>, vector<128x32xf32>
    %19 = tpu.transpose %18, [1, 0] : vector<128x32xf32> -> vector<32x128xf32>
    %20 = arith.cmpf one, %19, %19 : vector<32x128xf32>
    %cst_4 = arith.constant 0x7F800000 : f32
    %21 = vector.broadcast %cst_4 : f32 to vector<32x128xf32>
    %22 = arith.select %20, %21, %19 : vector<32x128xi1>, vector<32x128xf32>
    %cst_5 = arith.constant dense<0xFF800000> : vector<128xf32>
    %23 = vector.multi_reduction <maximumf>, %22, %cst_5 [0] : vector<32x128xf32> to vector<128xf32>
    %24 = vector.shape_cast %23 : vector<128xf32> to vector<1x128xf32>
    %25 = tpu.iota {dimensions = array<i32: 0>} : vector<32x128xi32>
    %26 = vector.broadcast %24 : vector<1x128xf32> to vector<32x128xf32>
    %27 = arith.cmpf oeq, %22, %26 : vector<32x128xf32>
    %c32_i32_6 = arith.constant 32 : i32
    %28 = vector.broadcast %c32_i32_6 : i32 to vector<32x128xi32>
    %29 = arith.select %27, %25, %28 : vector<32x128xi1>, vector<32x128xi32>
    %cst_7 = arith.constant dense<2147483647> : vector<128xi32>
    %30 = vector.multi_reduction <minsi>, %29, %cst_7 [0] : vector<32x128xi32> to vector<128xi32>
    %31 = vector.shape_cast %30 : vector<128xi32> to vector<1x128xi32>
    %c31_i32_8 = arith.constant 31 : i32
    %32 = vector.broadcast %c31_i32_8 : i32 to vector<1x128xi32>
    %33 = arith.minsi %31, %32 : vector<1x128xi32>
    %34 = tpu.iota {dimensions = array<i32: 1>} : vector<1x128xi32>
    %c1_i32 = arith.constant 1 : i32
    %35 = tpu.dynamic_rotate %33 by %c1_i32 dim 1 : vector<1x128xi32>, i32 -> vector<1x128xi32>
    %c0_i32_9 = arith.constant 0 : i32
    %36 = vector.broadcast %c0_i32_9 : i32 to vector<1x128xi32>
    %37 = arith.cmpi eq, %34, %36 : vector<1x128xi32>
    %38 = vector.shape_cast %17 : vector<1x1xi32> to vector<1x1xi32>
    %39 = vector.broadcast %38 : vector<1x1xi32> to vector<1x128xi32>
    %40 = arith.select %37, %39, %35 : vector<1x128xi1>, vector<1x128xi32>
    %41 = arith.cmpi ne, %33, %40 : vector<1x128xi32>
    %c0_i32_10 = arith.constant 0 : i32
    %42 = vector.broadcast %c0_i32_10 : i32 to vector<1x128xi32>
    %43 = arith.cmpi ne, %33, %42 : vector<1x128xi32>
    %44 = arith.andi %41, %43 : vector<1x128xi1>
    %c-1_i32_11 = arith.constant -1 : i32
    %45 = vector.broadcast %c-1_i32_11 : i32 to vector<1x128xi32>
    %46 = arith.select %44, %33, %45 : vector<1x128xi1>, vector<1x128xi32>
    %c0_12 = arith.constant 0 : index
    %c0_13 = arith.constant 0 : index
    %47 = vector.load %arg3[%c0_12, %c0_13] : memref<1x128xi32, #tpu.memory_space<vmem>>, vector<1x128xi32>
    tpu.vector_store %arg3[%c0_12, %c0_13], %46 {strides = array<i32>} : memref<1x128xi32, #tpu.memory_space<vmem>>, vector<1x128xi32>,
    return
  }
  func.func @transform_0(%arg0: i32) -> (i32, i32) {
    %c0_i32 = arith.constant 0 : i32
    %c0_i32_0 = arith.constant 0 : i32
    return %arg0, %c0_i32 : i32, i32
  }
  func.func @transform_1(%arg0: i32) -> (i32, i32) {
    %c16_i32 = arith.constant 16 : i32
    %0 = arith.muli %arg0, %c16_i32 : i32
    %c1_i32 = arith.constant 1 : i32
    %1 = arith.subi %0, %c1_i32 : i32
    %c0_i32 = arith.constant 0 : i32
    %2 = arith.maxsi %1, %c0_i32 : i32
    %c0_i32_0 = arith.constant 0 : i32
    %c0_i32_1 = arith.constant 0 : i32
    return %2, %c0_i32_0 : i32, i32
  }
  func.func @transform_2(%arg0: i32) -> (i32, i32) {
    %c0_i32 = arith.constant 0 : i32
    %c0_i32_0 = arith.constant 0 : i32
    return %c0_i32, %arg0 : i32, i32
  }
}

</mosaic_0001>

<bundles_post_ra>
// kernel: _ctc_decode_device.1
= control target key start
LH: loop header
LB: loop body
LE: loop exit
PB: predicated region body
PF: predicated region fallthrough
CT: control target
= control target key end

     0   :  { %s461_s9 = smov 0   ;;  %s511_s0 = inlined_call_operand.vmem [shape: f32[300,32], index: 0, kind: input, shape index: {}, may-alias: {0,1}]   ;;  %s512_s1 = inlined_call_operand.vmem [shape: f32[300,32], index: 1, kind: input, shape index: {}, may-alias: {0,1}]   ;;  %s513_s2 = inlined_call_operand.vmem [shape: s32[1,300], index: 2, kind: output, shape index: {}]  }
   0x1 LB: > { %s467_s10 = sadd.s32 4294967295, %s443_s9   ;;  %p411_p0 = scmp.ge.s32.totalorder %s443_s9, 1  ;;  %s443_s9 = sphi %s461_s9, %s12_s9  }
   0x2   : > { %p146_p1 = scmp.lt.s32.totalorder %s443_s9, 4 }
   0x4   : > { %p147_p2 = pnand %p411_p0, %p146_p1 }
   0x5   : > { %s412_s11 = sshll.u32 (!%p147_p2), %s467_s10, 4  ;;  %vm211_vm0 = vcmask (!%p147_p2), 253952   ;;  %v215_v19 = vlaneseq (!%p147_p2)  ;;  %s445_s21 = smov (!%p147_p2), 1  }
   0x6   : > { %150 = sbr.rel (%p147_p2) target bundleno = 468 (0x1d4), region = 28  ;;  %s415_s12 = sadd.s32 (!%p147_p2), 4294967295, %s412_s11 }
   0x7   : > { %p183_p3 = scmp.lt.s32.totalorder (!%p147_p2), %s412_s11, 37  ;;  %p194_p4 = scmp.gt.s32.totalorder (!%p147_p2), %s415_s12, 0  ;;  %v497_v20 = vand.u32 (!%p147_p2), 127, %v215_v19  ;;  %v306_v42 = vshrl.u32 (!%p147_p2), %v215_v19, 7 }
   0x8   : > { %p416_p5 = scmp.lt.s32.totalorder (!%p147_p2), %s415_s12, 37  ;;  %p207_p6 = scmp.eq.s32.totalorder (!%p147_p2), %s467_s10, 0 }
   0x9   : > { %v307_v44 = vadd.s32 (!%p147_p2), 8, %v306_v42  ;;  %v308_v45 = vadd.s32 (!%p147_p2), 16, %v306_v42  ;;  %v309_v46 = vadd.s32 (!%p147_p2), 24, %v306_v42  ;;  %p204_p7 = scmp.lt.s32.totalorder (!%p147_p2), %s467_s10, 2 }
   0xd   : > { %s515_s11 = smov (!%p183_p3, %s412_s11), 37  ;;  %s517_s12 = smov (!%p194_p4, %s415_s12), 0 }
   0xe   : > { %s413_s13 = sshll.u32 %s515_s11, 3  ;;  %s519_s12 = smov (!%p416_p5, %s517_s12), 37 }
   0xf   : > { %s475_s16 = scalar_lea.vmem %s511_s0, %s413_s13  ;;  %s421_s17 = sshll.u32 %s519_s12, 3 }
  0x10   : > { %v240_v0 = vld [vmem:[%s475_s16] sm:$0xff]  ;;  %s199_s20 = scalar_lea.vmem %s512_s1, %s421_s17  ;;  %v241_v2 = vld [vmem:[%s475_s16 + $0x8] sm:$0xff]  ;;  %v242_v5 = vld [vmem:[%s475_s16 + $0x10] sm:$0xff]  ;;  %s521_s10 = smov (!%p204_p7, %s467_s10), 2 }
  0x11   : > { %256 = vxpose.xlu1.b32.start [1/16] (narrow) %v240_v0, 32  ;;  %v208_v1 = vld [vmem:[%s199_s20 + $0x7] sm:$0x1]  ;;  %v243_v6 = vld [vmem:[%s475_s16 + $0x18] sm:$0xff]  ;;  %v245_v8 = vld [vmem:[%s475_s16 + $0x28] sm:$0xff]  ;;  %s206_s25 = scalar_lea.vmem %s513_s2, %s521_s10 }
  0x12   : > { %vm209_vm1 = vcmp.ne.f32.partialorder %v208_v1, %v208_v1  ;;  %v244_v7 = vld [vmem:[%s475_s16 + $0x20] sm:$0xff]  ;;  %v246_v9 = vld [vmem:[%s475_s16 + $0x30] sm:$0xff]  ;;  %v247_v10 = vld [vmem:[%s475_s16 + $0x38] sm:$0xff]  ;;  %s236_s22 = scalar_select %p207_p6, 1, 0 }
  0x13   : > { %v210_v3 = vsel %vm209_vm1, inf, %v208_v1  ;;  %v248_v11 = vld [vmem:[%s475_s16 + $0x40] sm:$0xff]  ;;  %v249_v12 = vld [vmem:[%s475_s16 + $0x48] sm:$0xff]  ;;  %v250_v13 = vld [vmem:[%s475_s16 + $0x50] sm:$0xff] }
  0x14   : > { %v212_v4 = vsel %vm211_vm0, %v210_v3, -inf  ;;  %v251_v14 = vld [vmem:[%s475_s16 + $0x58] sm:$0xff]  ;;  %v252_v15 = vld [vmem:[%s475_s16 + $0x60] sm:$0xff]  ;;  %v253_v16 = vld [vmem:[%s475_s16 + $0x68] sm:$0xff] }
  0x15   : > { %257 = vxpose.xlu1.b32.cont [2/16] (narrow) %v241_v2, 32  ;;  %213 = vmax.xlane.f32.xlu0 %v212_v4  ;;  %v254_v17 = vld [vmem:[%s475_s16 + $0x70] sm:$0xff]  ;;  %v255_v18 = vld [vmem:[%s475_s16 + $0x78] sm:$0xff] }
  0x19   : > { %258 = vxpose.xlu1.b32.cont [3/16] (narrow) %v242_v5, 32  ;;  %v237_v5 = vstv %s236_s22 }
  0x1d   : > { %259 = vxpose.xlu1.b32.cont [4/16] (narrow) %v243_v6, 32 }
  0x21   : > { %260 = vxpose.xlu1.b32.cont [5/16] (narrow) %v244_v7, 32 }
  0x25   : > { %261 = vxpose.xlu1.b32.cont [6/16] (narrow) %v245_v8, 32 }
  0x29   : > { %262 = vxpose.xlu1.b32.cont [7/16] (narrow) %v246_v9, 32 }
  0x2d   : > { %263 = vxpose.xlu1.b32.cont [8/16] (narrow) %v247_v10, 32 }
  0x31   : > { %264 = vxpose.xlu1.b32.cont [9/16] (narrow) %v248_v11, 32 }
  0x35   : > { %265 = vxpose.xlu1.b32.cont [10/16] (narrow) %v249_v12, 32 }
  0x39   : > { %266 = vxpose.xlu1.b32.cont [11/16] (narrow) %v250_v13, 32 }
  0x3d   : > { %267 = vxpose.xlu1.b32.cont [12/16] (narrow) %v251_v14, 32 }
  0x41   : > { %268 = vxpose.xlu1.b32.cont [13/16] (narrow) %v252_v15, 32 }
  0x45   : > { %269 = vxpose.xlu1.b32.cont [14/16] (narrow) %v253_v16, 32 }
  0x49   : > { %270 = vxpose.xlu1.b32.cont [15/16] (narrow) %v254_v17, 32 }
  0x4d   : > { %271 = vxpose.xlu1.b32.end [16/16] (narrow) %v255_v18, 32 }
  0x91   : > { %v272_v26 = vpop.trf.xlu1 }
  0x92   : > { %vm288_vm3 = vcmp.ne.f32.partialorder %v272_v26, %v272_v26 }
  0x93   : > { %v292_v30 = vsel %vm288_vm3, inf, %v272_v26  ;;  %vm238_vm3 = vcmp.eq.s32.totalorder %v237_v5, 1 }
  0x95   : > { %v273_v27 = vpop.trf.xlu1 }
  0x96   : > { %vm289_vm4 = vcmp.ne.f32.partialorder %v273_v27, %v273_v27 }
  0x97   : > { %v293_v31 = vsel %vm289_vm4, inf, %v273_v27 }
  0x98   : > { %v296_v34 = vmax.f32 %v292_v30, %v293_v31 }
  0x99   : > { %v274_v28 = vpop.trf.xlu1 }
  0x9a   : > { %vm290_vm5 = vcmp.ne.f32.partialorder %v274_v28, %v274_v28 }
  0x9b   : > { %v294_v32 = vsel %vm290_vm5, inf, %v274_v28  ;;  %vm337_vm5 = vcmp.eq.s32.totalorder %v497_v20, 0 }
  0x9d   : > { %v275_v29 = vpop.trf.xlu1 }
  0x9e   : > { %vm291_vm6 = vcmp.ne.f32.partialorder %v275_v29, %v275_v29 }
  0x9f   : > { %v295_v33 = vsel %vm291_vm6, inf, %v275_v29 }
  0xa0   : > { %v297_v35 = vmax.f32 %v294_v32, %v295_v33 }
  0xa2   : > { %v214_v21 = vpop.xlane.xlu0 %213  ;;  %v298_v36 = vmax.f32 %v296_v34, %v297_v35 }
  0xa3   : > { %vm217_vm2 = vcmp.eq.f32.partialorder %v210_v3, %v214_v21 }
  0xa4   : > { %v218_v22 = vsel %vm217_vm2, %v497_v20, 32  ;;  %v299_v37 = vrot.slane %v298_v36, 4 }
  0xa5   : > { %v219_v23 = vsel %vm211_vm0, %v218_v22, 2147483647 }
  0xa6   : > { %v221_v24 = vshra.s32 %v219_v23, 16  ;;  %v300_v38 = vmax.f32 %v298_v36, %v299_v37  ;;  %v220_v55 = vand.u32 65535, %v219_v23 }
  0xa8   : > { %v223_v25 = vcvt.s32.f32 %v221_v24  ;;  %v301_v39 = vrot.slane %v300_v38, 2  ;;  %v222_v58 = vcvt.s32.f32 %v220_v55 }
  0xaa   : > { %224 = vmin.xlane.f32.xlu0 %v223_v25  ;;  %v302_v40 = vmax.f32 %v300_v38, %v301_v39 }
  0xac   : > { %v303_v41 = vrot.slane %v302_v40, 1 }
  0xae   : > { %v304_v43 = vmax.f32 %v302_v40, %v303_v41 }
  0xb0   : > { %vm310_vm7 = vcmp.eq.f32.partialorder %v292_v30, %v304_v43  ;;  %vm311_vm8 = vcmp.eq.f32.partialorder %v293_v31, %v304_v43  ;;  %vm312_vm9 = vcmp.eq.f32.partialorder %v294_v32, %v304_v43  ;;  %vm313_vm10 = vcmp.eq.f32.partialorder %v295_v33, %v304_v43 }
  0xb1   : > { %v314_v47 = vsel %vm310_vm7, %v306_v42, 32  ;;  %v315_v48 = vsel %vm311_vm8, %v307_v44, 32  ;;  %v316_v49 = vsel %vm312_vm9, %v308_v45, 32  ;;  %v317_v50 = vsel %vm313_vm10, %v309_v46, 32 }
  0xb2   : > { %vm318_vm11 = vcmp.lt.s32.totalorder %v314_v47, %v315_v48  ;;  %vm320_vm12 = vcmp.lt.s32.totalorder %v316_v49, %v317_v50 }
  0xb3   : > { %v319_v51 = vsel %vm318_vm11, %v314_v47, %v315_v48  ;;  %v321_v52 = vsel %vm320_vm12, %v316_v49, %v317_v50 }
  0xb4   : > { %vm322_vm13 = vcmp.lt.s32.totalorder %v319_v51, %v321_v52 }
  0xb5   : > { %v323_v53 = vsel %vm322_vm13, %v319_v51, %v321_v52 }
  0xb6   : > { %v324_v54 = vrot.slane %v323_v53, 4 }
  0xb8   : > { %vm325_vm14 = vcmp.lt.s32.totalorder %v323_v53, %v324_v54 }
  0xb9   : > { %v326_v56 = vsel %vm325_vm14, %v323_v53, %v324_v54 }
  0xba   : > { %v327_v59 = vrot.slane %v326_v56, 2 }
  0xbc   : > { %vm328_vm0 = vcmp.lt.s32.totalorder %v326_v56, %v327_v59 }
  0xbd   : > { %v329_v61 = vsel %vm328_vm0, %v326_v56, %v327_v59 }
  0xbe   : > { %v330_v62 = vrot.slane %v329_v61, 1 }
  0xc0   : > { %vm331_vm1 = vcmp.lt.s32.totalorder %v329_v61, %v330_v62 }
  0xc1   : > { %v332_v63 = vsel %vm331_vm1, %v329_v61, %v330_v62 }
  0xc2   : > { %vm333_vm2 = vcmp.lt.s32.totalorder %v332_v63, 31 }
  0xc3   : > { %v334_v0 = vsel %vm333_vm2, %v332_v63, 31 }
  0xc4   : > { %vm340_vm7 = vcmp.ne.s32.totalorder %v334_v0, 0 }
 0x137   : > { %v225_v57 = vpop.xlane.xlu0 %224 }
 0x138   : > { %vm226_vm15 = vcmp.eq.f32.partialorder %v223_v25, %v225_v57  ;;  %v231_v1 = vcvt.f32.s32 %v225_v57 }
 0x139   : > { %v227_v60 = vsel %vm226_vm15, %v222_v58, inf }
 0x13a   : > { %228 = vmin.xlane.f32.xlu0 %v227_v60  ;;  %v232_v3 = vshll.u32 %v231_v1, 16 }
 0x150   : > { %335 = vrot.lane.b32.xlu0 %v334_v0, %s445_s21 }
 0x1c7   : > { %v229_v2 = vpop.xlane.xlu0 %228 }
 0x1c8   : > { %v230_v4 = vcvt.f32.s32 %v229_v2 }
 0x1ca   : > { %v233_v6 = vadd.s32 %v232_v3, %v230_v4 }
 0x1cb   : > { %v336_v9 = vpop.permute.xlu0 %335 }
 0x1cc   : > { %vm234_vm4 = vcmp.lt.s32.totalorder %v233_v6, 31 }
 0x1cd   : > { %v235_v7 = vsel %vm234_vm4, %v233_v6, 31 }
 0x1ce   : > { %v239_v8 = vsel %vm238_vm3, 4294967295, %v235_v7 }
 0x1cf   : > { %v338_v10 = vsel %vm337_vm5, %v239_v8, %v336_v9 }
 0x1d0   : > { %vm339_vm6 = vcmp.ne.s32.totalorder %v334_v0, %v338_v10 }
 0x1d1   : > { %vm341_vm8 = vmand %vm339_vm6, %vm340_vm7 }
 0x1d2   : > { %v342_v11 = vsel %vm341_vm8, %v334_v0, 4294967295 }
 0x1d3   : > { %343 = vst [vmem:[%s206_s25] sm:$0x1] %v342_v11 }
 0x1d4 PF: > { %s12_s9 = sadd.s32 1, %s443_s9  }
 0x1d5   : > { %p9_p8 = scmp.ge.s32.totalorder %s12_s9, 5  }
 0x1d7   :  { %11 = sbr.rel (!%p9_p8) target bundleno = 1 (0x1), region = 61 }

</bundles_post_ra>
